<compile_context>
chip_gen: v7x
topology: tpu7x:2x2x1
jax: 0.10.0
libtpu: 0.0.40
codegen_flags: <defaults>
</compile_context>

<pallas_src>
import math

import jax
import jax.numpy as jnp
from jax.experimental import pallas as pl
from jax.experimental.pallas import tpu as pltpu


def _make_merge_kernel(n_layers):
    """Kernel over one lane-dense spatial tile.

    refs = (w_smem, img_0, ..., img_{n-1}, out)
      w_smem : SMEM (n_layers,) f32 -- already re-indexed to the quirky pairing.
      img_i  : VMEM (tile_rows, lanes)
      out    : VMEM (tile_rows, lanes)
    """

    def kernel(*refs):
        w_ref = refs[0]
        img_refs = refs[1:1 + n_layers]
        out_ref = refs[1 + n_layers]

        # Fused weighted sum over layers, accumulated in f32, stored once.
        acc = img_refs[0][...].astype(jnp.float32) * w_ref[0]
        for i in range(1, n_layers):
            acc = acc + img_refs[i][...].astype(jnp.float32) * w_ref[i]
        out_ref[...] = acc.astype(out_ref.dtype)

    return kernel


def _merge_jnp(images, eff_w):
    """Fused XLA fallback (small inputs / shapes not factorable into lanes)."""
    acc = images[0].astype(jnp.float32) * eff_w[0]
    for i in range(1, len(images)):
        acc = acc + images[i].astype(jnp.float32) * eff_w[i]
    return acc.astype(images[0].dtype)


def _choose_lanes(total):
    """Largest lane width (multiple of 128) that divides the element count."""
    for cand in (1024, 512, 256, 128):
        if total % cand == 0 and total // cand >= 8:
            return cand
    return None


def _vmem_capacity_bytes():
    try:
        info = pltpu.get_tpu_info()
        cap = int(getattr(info, "vmem_capacity_bytes", 0))
        if cap > 0:
            return cap
    except Exception:
        pass
    return 64 << 20  # conservative default (v7x per-TC size)


def _pick_tile_rows(rows, lanes, n_layers, itemsize, vmem_cap):
    # Generation-aware pipeline budget: ~half of physical VMEM, capped so
    # v5e/v6e (128 MiB) use ~56 MiB and v7x (64 MiB/TC) uses ~32 MiB.
    pipeline_budget = min(vmem_cap // 2, 56 << 20)
    # Per-row bytes: double-buffered (n inputs + 1 output) tiles in the input
    # dtype + ~2x a tile of f32 for the accumulator / Mosaic intermediates.
    bytes_per_row = lanes * (2 * (n_layers + 1) * itemsize + 2 * 4)
    cap_rows = max(8, (pipeline_budget // bytes_per_row) // 8 * 8)

    # Aim for >= 8 tiles on big inputs (shards across v7x's 2 TensorCores and
    # gives the double-buffer pipeline depth); never split tiny inputs.
    if rows >= 8 * 64:
        target_tiles = 8
    elif rows >= 16:
        target_tiles = 2
    else:
        target_tiles = 1

    tile_rows = min(cap_rows, max(8, -(-rows // target_tiles)))
    tile_rows = max(8, (tile_rows // 8) * 8)
    tile_rows = min(tile_rows, max(8, (rows // 8) * 8))

    # Prefer a nearby divisor of rows so there is no ragged last block; if
    # none exists the ragged block is still correct (masked store).
    if rows % tile_rows != 0:
        for cand in range(tile_rows, max(8, tile_rows - 512) - 1, -8):
            if rows % cand == 0:
                tile_rows = cand
                break
    return tile_rows


def simple_merging_layer(images, weights, *, force_pallas=False):
    """images: list of n_layers arrays, each [B, C, H, W] (same shape/dtype).
    weights: [n_layers] f32 (the learned per-layer scalars).
    Returns the merged image with the original shape."""
    n_layers = len(images)
    assert n_layers > 0
    shape = images[0].shape
    dtype = images[0].dtype
    itemsize = jnp.dtype(dtype).itemsize
    total = math.prod(shape)

    # Reproduce the PyTorch loop's weight indexing exactly:
    #   images[0] uses w[0]; images[i+1] uses w[i]  (NOT w[i+1])
    eff_idx = [0] + list(range(max(0, n_layers - 1)))
    eff_w = weights[jnp.asarray(eff_idx, dtype=jnp.int32)].astype(jnp.float32)

    lanes = _choose_lanes(total)

    # Small-input bypass and unfactorable-lane-tail path: a fused XLA
    # elementwise op beats a pallas_call launch and avoids padding copies.
    small = total * (n_layers + 1) * itemsize < (1 << 21)
    if lanes is None or (small and not force_pallas):
        return _merge_jnp(images, eff_w).reshape(shape)

    rows = total // lanes
    vmem_cap = _vmem_capacity_bytes()
    tile_rows = _pick_tile_rows(rows, lanes, n_layers, itemsize, vmem_cap)
    num_tiles = pl.cdiv(rows, tile_rows)

    # No padded copies: a contiguous reshape is free; Pallas masks any ragged
    # last block on store.
    flats = [img.reshape(rows, lanes) for img in images]

    tile_bytes = tile_rows * lanes * itemsize
    acc_bytes = tile_rows * lanes * 4            # f32 accumulator
    vmem_bytes = 2 * (n_layers + 1) * tile_bytes + 2 * acc_bytes + (2 << 20)
    vmem_bytes = max(vmem_bytes, 8 << 20)
    vmem_bytes = min(vmem_bytes, max(8 << 20, vmem_cap - (8 << 20)))

    img_spec = pl.BlockSpec((tile_rows, lanes), lambda i: (i, 0))

    out2d = pl.pallas_call(
        _make_merge_kernel(n_layers),
        out_shape=jax.ShapeDtypeStruct((rows, lanes), dtype),
        grid=(num_tiles,),
        in_specs=[pl.BlockSpec(memory_space=pltpu.MemorySpace.SMEM)]  # weights
                 + [img_spec] * n_layers,                              # images
        out_specs=img_spec,
        compiler_params=pltpu.CompilerParams(
            dimension_semantics=("parallel",),     # spatial tiles -> both TCs
            vmem_limit_bytes=int(vmem_bytes),
        ),
    )(eff_w, *flats)

    return out2d.reshape(shape)


if __name__ == "__main__":
    key = jax.random.PRNGKey(0)
    n_layers = 3
    B, C, H, W = 2, 4, 16, 16

    keys = jax.random.split(key, n_layers)
    images = [jax.random.normal(k, (B, C, H, W), dtype=jnp.float32) for k in keys]

    # Deterministic parameter init exactly as in __init__: each weight = 1/n_layers
    weights = jnp.full((n_layers,), 1.0 / n_layers, dtype=jnp.float32)

    # force_pallas=True so the Pallas kernel (not the small-input bypass) runs.
    out = simple_merging_layer(images, weights, force_pallas=True)
    jax.block_until_ready(out)

    # Pure-JAX reference check (same quirky indexing as the PyTorch forward)
    ref = images[0] * weights[0]
    for i in range(n_layers - 1):
        ref = ref + images[i + 1] * weights[i]
    assert out.shape == (B, C, H, W)
    assert jnp.allclose(out, ref, atol=1e-6), "mismatch vs reference"

    print("KERNEL_OK")
</pallas_src>

<mosaic_0001>
module attributes {stable_mosaic.version = 11 : i64} {
  func.func @kernel(%arg0: i32, %arg1: memref<3xf32, #tpu.memory_space<smem>>, %arg2: memref<8x256xf32, #tpu.memory_space<vmem>>, %arg3: memref<8x256xf32, #tpu.memory_space<vmem>>, %arg4: memref<8x256xf32, #tpu.memory_space<vmem>>, %arg5: memref<8x256xf32, #tpu.memory_space<vmem>>) attributes {dimension_semantics = [#tpu.dimension_semantics<parallel>], iteration_bounds = array<i64: 1>, scalar_prefetch = 0 : i64, scratch_operands = 0 : i64, tpu.core_type = #tpu.core_type<tc>, window_params = [{transform_indices = @transform_0, window_bounds = array<i64: 3>}, {transform_indices = @transform_1, window_bounds = array<i64: 8, 256>}, {transform_indices = @transform_2, window_bounds = array<i64: 8, 256>}, {transform_indices = @transform_3, window_bounds = array<i64: 8, 256>}, {transform_indices = @transform_4, window_bounds = array<i64: 8, 256>}]} {
    %c0 = arith.constant 0 : index
    %c0_0 = arith.constant 0 : index
    %0 = vector.load %arg2[%c0, %c0_0] : memref<8x256xf32, #tpu.memory_space<vmem>>, vector<8x256xf32>
    %c0_1 = arith.constant 0 : index
    %1 = memref.load %arg1[%c0_1] : memref<3xf32, #tpu.memory_space<smem>>
    %2 = vector.broadcast %1 : f32 to vector<8x256xf32>
    %3 = arith.mulf %0, %2 : vector<8x256xf32>
    %c0_2 = arith.constant 0 : index
    %c0_3 = arith.constant 0 : index
    %4 = vector.load %arg3[%c0_2, %c0_3] : memref<8x256xf32, #tpu.memory_space<vmem>>, vector<8x256xf32>
    %c1 = arith.constant 1 : index
    %5 = memref.load %arg1[%c1] : memref<3xf32, #tpu.memory_space<smem>>
    %6 = vector.broadcast %5 : f32 to vector<8x256xf32>
    %7 = arith.mulf %4, %6 : vector<8x256xf32>
    %8 = arith.addf %3, %7 : vector<8x256xf32>
    %c0_4 = arith.constant 0 : index
    %c0_5 = arith.constant 0 : index
    %9 = vector.load %arg4[%c0_4, %c0_5] : memref<8x256xf32, #tpu.memory_space<vmem>>, vector<8x256xf32>
    %c2 = arith.constant 2 : index
    %10 = memref.load %arg1[%c2] : memref<3xf32, #tpu.memory_space<smem>>
    %11 = vector.broadcast %10 : f32 to vector<8x256xf32>
    %12 = arith.mulf %9, %11 : vector<8x256xf32>
    %13 = arith.addf %8, %12 : vector<8x256xf32>
    %c0_6 = arith.constant 0 : index
    %c0_7 = arith.constant 0 : index
    %14 = vector.load %arg5[%c0_6, %c0_7] : memref<8x256xf32, #tpu.memory_space<vmem>>, vector<8x256xf32>
    tpu.vector_store %arg5[%c0_6, %c0_7], %13 {strides = array<i32>} : memref<8x256xf32, #tpu.memory_space<vmem>>, vector<8x256xf32>,
    return
  }
  func.func @transform_0(%arg0: i32) -> i32 {
    %c0_i32 = arith.constant 0 : i32
    %c0_i32_0 = arith.constant 0 : i32
    return %c0_i32 : i32
  }
  func.func @transform_1(%arg0: i32) -> (i32, i32) {
    %c0_i32 = arith.constant 0 : i32
    %c0_i32_0 = arith.constant 0 : i32
    return %arg0, %c0_i32 : i32, i32
  }
  func.func @transform_2(%arg0: i32) -> (i32, i32) {
    %c0_i32 = arith.constant 0 : i32
    %c0_i32_0 = arith.constant 0 : i32
    return %arg0, %c0_i32 : i32, i32
  }
  func.func @transform_3(%arg0: i32) -> (i32, i32) {
    %c0_i32 = arith.constant 0 : i32
    %c0_i32_0 = arith.constant 0 : i32
    return %arg0, %c0_i32 : i32, i32
  }
  func.func @transform_4(%arg0: i32) -> (i32, i32) {
    %c0_i32 = arith.constant 0 : i32
    %c0_i32_0 = arith.constant 0 : i32
    return %arg0, %c0_i32 : i32, i32
  }
}

</mosaic_0001>

<bundles_post_ra>
// kernel: tpu_custom_call.1
= control target key start
LH: loop header
LB: loop body
LE: loop exit
PB: predicated region body
PF: predicated region fallthrough
CT: control target
= control target key end

     0   :  { %9 = vsyncpa [#allocation5], 0  ;;  %s308_s0 = inlined_call_operand.hbm [shape: f32[3], index: 0, kind: input, shape index: {}]   ;;  %s309_s1 = inlined_call_operand.hbm [shape: f32[8,256], index: 1, kind: input, shape index: {}]   ;;  %s310_s2 = inlined_call_operand.hbm [shape: f32[8,256], index: 2, kind: input, shape index: {}]   ;;  %s311_s3 = inlined_call_operand.hbm [shape: f32[8,256], index: 3, kind: input, shape index: {}]   ;;  %s312_s4 = inlined_call_operand.hbm [shape: f32[8,256], index: 4, kind: output, shape index: {}]  }
   0x1   :  { %10 = vsyncpa [#allocation3], 0 }
   0x2   :  { %11 = vsyncpa [#allocation8], 0 }
   0x3   :  { %12 = vsyncpa [#allocation4], 0  ;;  %s218_s15 = smov [#allocation7]   ;;  %s219_s17 = smov [#allocation6]  }
   0x4   :  { %s37_s16 = sshll.u32 %s218_s15, 4  ;;  %s27_s18 = sshll.u32 %s219_s17, 4  ;;  %s38_s16 = int_to_ptr.vmem [resolvable:$true] %s37_s16  ;;  %s28_s18 = int_to_ptr.vmem [resolvable:$true] %s27_s18 }
   0x5   :  { %s112_s21 = scalar_lea.hbm %s310_s2, 256 }
   0x6   :  { %p113_p0 = scmp.ne.s32.totalorder %s310_s2, %s112_s21  ;;  %p116_p1 = scmp.lt.u32.totalorder %s112_s21, %s310_s2 }
   0x8   :  { %p118_p2 = pnand %p116_p1, %p113_p0 }
   0xa   :  { %121 = shalt.err (!%p118_p2)
}
   0xb   :  { %s122_s26 = scalar_lea.vmem %s38_s16, 256  ;;  %p127_p4 = scmp.lt.s32.totalorder %s38_s16, %s38_s16 }
   0xc   :  { %p123_p3 = scmp.ne.s32.totalorder %s38_s16, %s122_s26  ;;  %p128_p5 = scmp.lt.s32.totalorder %s122_s26, %s122_s26 }
   0xe   :  { %p129_p6 = por %p128_p5, %p127_p4 }
  0x10   :  { %p130_p7 = pnand %p129_p6, %p123_p3 }
  0x12   :  { %133 = shalt.err (!%p130_p7)
}
  0x13   :  { %40 = dma.hbm_to_vmem [thread:$0]  %s310_s2, 256, %s38_s16, [#allocation8]  }
  0x14   :  { %s134_s5 = scalar_lea.hbm %s308_s0, 16 }
  0x15   :  { %p135_p8 = scmp.ne.s32.totalorder %s308_s0, %s134_s5  ;;  %p138_p9 = scmp.lt.u32.totalorder %s134_s5, %s308_s0 }
  0x17   :  { %p140_p10 = pnand %p138_p9, %p135_p8 }
  0x19   :  { %143 = shalt.err (!%p140_p10)
}
  0x1a   :  { %s220_s10 = smov [#allocation2]   ;;  %s144_s14 = scalar_lea.hbm %s309_s1, 256 }
  0x1b   :  { %20 = dma.hbm_to_smem %s308_s0, 16, %s220_s10, [#allocation5]  }
  0x1c   :  { %p145_p11 = scmp.ne.s32.totalorder %s309_s1, %s144_s14  ;;  %p148_p12 = scmp.lt.u32.totalorder %s144_s14, %s309_s1 }
  0x1e   :  { %p150_p13 = pnand %p148_p12, %p145_p11 }
  0x20   :  { %153 = shalt.err (!%p150_p13)
}
  0x21   :  { %s154_s20 = scalar_lea.vmem %s28_s18, 256  ;;  %p159_p1 = scmp.lt.s32.totalorder %s28_s18, %s28_s18 }
  0x22   :  { %p155_p0 = scmp.ne.s32.totalorder %s28_s18, %s154_s20  ;;  %p160_p2 = scmp.lt.s32.totalorder %s154_s20, %s154_s20 }
  0x24   :  { %p161_p3 = por %p160_p2, %p159_p1 }
  0x26   :  { %p162_p4 = pnand %p161_p3, %p155_p0 }
  0x28   :  { %165 = shalt.err (!%p162_p4)
}
  0x29   :  { %30 = dma.hbm_to_vmem [thread:$0]  %s309_s1, 256, %s28_s18, [#allocation3]  }
  0x2a   :  { %s221_s22 = smov [#allocation9]   ;;  %s166_s26 = scalar_lea.hbm %s311_s3, 256 }
  0x2b   :  { %s47_s23 = sshll.u32 %s221_s22, 4  ;;  %p167_p5 = scmp.ne.s32.totalorder %s311_s3, %s166_s26  ;;  %s48_s23 = int_to_ptr.vmem [resolvable:$true] %s47_s23 }
  0x2c   :  { %p170_p6 = scmp.lt.u32.totalorder %s166_s26, %s311_s3 }
  0x2e   :  { %p172_p7 = pnand %p170_p6, %p167_p5 }
  0x30   :  { %175 = shalt.err (!%p172_p7)
}
  0x31   :  { %s176_s5 = scalar_lea.vmem %s48_s23, 256  ;;  %p181_p9 = scmp.lt.s32.totalorder %s48_s23, %s48_s23 }
  0x32   :  { %p177_p8 = scmp.ne.s32.totalorder %s48_s23, %s176_s5  ;;  %p182_p10 = scmp.lt.s32.totalorder %s176_s5, %s176_s5 }
  0x34   :  { %p183_p11 = por %p182_p10, %p181_p9 }
  0x36   :  { %p184_p12 = pnand %p183_p11, %p177_p8 }
  0x38   :  { %187 = shalt.err (!%p184_p12)
}
  0x39   :  { %50 = dma.hbm_to_vmem [thread:$0]  %s311_s3, 256, %s48_s23, [#allocation8]  }
  0x3a   :  { %210 = dma.done.wait [#allocation5], 16  }
  0x3b   :  { %211 = vsyncadd [#allocation5], 4294967280 }
  0x3c   :  { %212 = dma.done.wait [#allocation3], 256  }
  0x3d   :  { %213 = vsyncadd [#allocation3], 4294967040 }
  0x3e   :  { %214 = dma.done.wait [#allocation8], 512  }
  0x3f   :  { %215 = vsyncadd [#allocation8], 4294966784 }
  0x40   :  { %63 = sfence }
  0x41   :  { %s66_s6 = sld [smem:[#allocation2]]  ;;  %s105_s7 = sld [smem:[#allocation2 + $0x1]]  ;;  %v64_v0 = vld [vmem:[#allocation6] sm:$0xff]  ;;  %v70_v1 = vld [vmem:[#allocation7] sm:$0xff]  ;;  %v65_v2 = vld [vmem:[#allocation6 + $0x8] sm:$0xff] }
  0x42   :  { %s106_s8 = sld [smem:[#allocation2 + $0x2]]  ;;  %v78_v3 = vld [vmem:[#allocation9] sm:$0xff]  ;;  %v71_v4 = vld [vmem:[#allocation7 + $0x8] sm:$0xff]  ;;  %v79_v5 = vld [vmem:[#allocation9 + $0x8] sm:$0xff]  ;;  %s222_s3 = smov [#allocation10]  }
  0x43   :  { %s94_s9 = sshll.u32 %s222_s3, 4  ;;  %s95_s9 = int_to_ptr.vmem [resolvable:$true] %s94_s9 }
  0x44   :  { %s188_s10 = scalar_lea.vmem %s95_s9, 256  ;;  %p193_p0 = scmp.lt.s32.totalorder %s95_s9, %s95_s9 }
  0x45   :  { %p189_p13 = scmp.ne.s32.totalorder %s95_s9, %s188_s10  ;;  %p194_p1 = scmp.lt.s32.totalorder %s188_s10, %s188_s10 }
  0x47   :  { %v67_v6 = vstv %s66_s6  ;;  %v73_v7 = vstv %s105_s7  ;;  %p195_p2 = por %p194_p1, %p193_p0 }
  0x48   :  { %v68_v8 = vmul.f32 %v67_v6, %v64_v0  ;;  %v74_v9 = vmul.f32 %v73_v7, %v70_v1  ;;  %v81_v10 = vstv %s106_s8  ;;  %v69_v11 = vmul.f32 %v67_v6, %v65_v2 }
  0x49   :  { %v82_v12 = vmul.f32 %v81_v10, %v78_v3  ;;  %v75_v13 = vmul.f32 %v73_v7, %v71_v4  ;;  %v83_v14 = vmul.f32 %v81_v10, %v79_v5  ;;  %p196_p3 = pnand %p195_p2, %p189_p13 }
  0x4a   :  { %v76_v15 = vadd.f32 %v74_v9, %v68_v8 }
  0x4b   :  { %v77_v16 = vadd.f32 %v75_v13, %v69_v11 }
  0x4c   :  { %v84_v17 = vadd.f32 %v82_v12, %v76_v15 }
  0x4d   :  { %v85_v18 = vadd.f32 %v83_v14, %v77_v16 }
  0x4e   :  { %86 = vst [vmem:[#allocation10] sm:$0xff] %v84_v17 }
  0x4f   :  { %87 = vst [vmem:[#allocation10 + $0x8] sm:$0xff] %v85_v18 }
  0x50   :  { %199 = shalt.err (!%p196_p3)
}
  0x51   :  { %s200_s2 = scalar_lea.hbm %s312_s4, 256 }
  0x52   :  { %p201_p4 = scmp.ne.s32.totalorder %s312_s4, %s200_s2  ;;  %p204_p5 = scmp.lt.u32.totalorder %s200_s2, %s312_s4 }
  0x54   :  { %p206_p6 = pnand %p204_p5, %p201_p4 }
  0x56   :  { %209 = shalt.err (!%p206_p6)
}
  0x57   :  { %97 = dma.vmem_to_hbm [thread:$0]  %s95_s9, 256, %s312_s4, [#allocation4]  }
  0x58   :  { %216 = dma.done.wait [#allocation4], 256  }
  0x59   :  { %217 = vsyncadd [#allocation4], 4294967040 }
  0x5a   :  { %101 = vsyncpa [#allocation3], 1 }
  0x5b   :  { %102 = vsyncpa [#allocation8], 1 }
  0x5c   :  { %103 = vsyncpa [#allocation4], 1 }
  0x5d   :  { %104 = vsyncpa [#allocation5], 1 }

</bundles_post_ra>
